<compile_context>
chip_gen: v5e
topology: v5e:2x2
jax: 0.10.0
libtpu: 0.0.40
codegen_flags: <defaults>
</compile_context>

<pallas_src>
import jax
import jax.numpy as jnp
from jax.experimental import pallas as pl
from jax.experimental.pallas import tpu as pltpu


IN_FEATURES = 784
OUT_FEATURES = 10
N_PAD = 128          # lane-dense output width
DEFAULT_TILE_B = 512  # batch rows per grid step (multiple of 8)


def _round_up(x, m):
    return (x + m - 1) // m * m


def linear_kernel(x_ref, w_ref, b_ref, o_ref):
    # x_ref: (TB, 784)  w_ref: (784, 128)  b_ref: (1, 128)  o_ref: (TB, 128)
    o_ref[...] = (
        jnp.dot(x_ref[...], w_ref[...], preferred_element_type=jnp.float32)
        + b_ref[...]
    )


def prepare_params(weight, bias):
    """One-time parameter prep: transpose + zero-pad to lane-dense width.

    weight: (10, 784) PyTorch nn.Linear convention (out_features, in_features)
    bias:   (10,)
    returns w_pad (784, 128), b_pad (1, 128)
    """
    w_pad = jnp.zeros((IN_FEATURES, N_PAD), dtype=jnp.float32)
    w_pad = w_pad.at[:, :OUT_FEATURES].set(weight.T.astype(jnp.float32))
    b_pad = jnp.zeros((1, N_PAD), dtype=jnp.float32)
    b_pad = b_pad.at[:, :OUT_FEATURES].set(bias.astype(jnp.float32))
    return w_pad, b_pad


def net_forward(x, w_pad, b_pad, *, tile_b=DEFAULT_TILE_B):
    """Forward pass of Net.

    x:     (B, 1, 28, 28) float32, NCHW
    w_pad: (784, 128) float32 (pre-transposed, zero-padded weight)
    b_pad: (1, 128)   float32 (zero-padded bias)
    returns (B, 10) float32 logits
    """
    B = x.shape[0]
    x_flat = x.reshape(B, -1)                              # Flatten (glue)

    # Batch tiling: TB multiple of 8, pad B up to a multiple of TB.
    TB = min(tile_b, _round_up(B, 8))
    B_pad = _round_up(B, TB)
    if B_pad != B:
        x_flat = jnp.pad(x_flat, ((0, B_pad - B), (0, 0)))

    grid = (B_pad // TB,)

    out_padded = pl.pallas_call(
        linear_kernel,
        out_shape=jax.ShapeDtypeStruct((B_pad, N_PAD), jnp.float32),
        grid=grid,
        in_specs=[
            # x streams per batch tile (double-buffered by Pallas).
            pl.BlockSpec((TB, IN_FEATURES), lambda i: (i, 0)),
            # weight/bias: constant block index -> fetched once, VMEM-resident.
            pl.BlockSpec((IN_FEATURES, N_PAD), lambda i: (0, 0)),
            pl.BlockSpec((1, N_PAD), lambda i: (0, 0)),
        ],
        out_specs=pl.BlockSpec((TB, N_PAD), lambda i: (i, 0)),
        compiler_params=pltpu.CompilerParams(
            dimension_semantics=("parallel",),
        ),
    )(x_flat, w_pad, b_pad)

    # Drop batch padding and the zero-padded output lanes.
    return out_padded[:B, :OUT_FEATURES]


if __name__ == "__main__":
    key = jax.random.PRNGKey(0)
    k_x, k_w, k_b = jax.random.split(key, 3)

    B, C, H, W = 2, 1, 28, 28                 # Linear(784, 10) implies 1*28*28 inputs

    x = jax.random.normal(k_x, (B, C, H, W), dtype=jnp.float32)
    # Deterministic synthetic parameters (PyTorch-like uniform scale 1/sqrt(fan_in))
    bound = 1.0 / jnp.sqrt(IN_FEATURES)
    weight = jax.random.uniform(
        k_w, (OUT_FEATURES, IN_FEATURES), minval=-bound, maxval=bound,
        dtype=jnp.float32,
    )
    bias = jax.random.uniform(
        k_b, (OUT_FEATURES,), minval=-bound, maxval=bound, dtype=jnp.float32
    )

    # One-time param prep (would be constant-folded / cached in training code).
    w_pad, b_pad = prepare_params(weight, bias)

    out = net_forward(x, w_pad, b_pad)
    jax.block_until_ready(out)

    # Correctness check against plain-JAX reference
    ref = x.reshape(B, -1) @ weight.T + bias
    assert out.shape == (B, OUT_FEATURES)
    assert jnp.allclose(out, ref, atol=1e-5, rtol=1e-5)

    print("KERNEL_OK")
</pallas_src>

<mosaic_0001>
module attributes {stable_mosaic.version = 11 : i64} {
  func.func @linear_kernel(%arg0: i32, %arg1: memref<8x784xf32, #tpu.memory_space<vmem>>, %arg2: memref<784x128xf32, #tpu.memory_space<vmem>>, %arg3: memref<1x128xf32, #tpu.memory_space<vmem>>, %arg4: memref<8x128xf32, #tpu.memory_space<vmem>>) attributes {dimension_semantics = [#tpu.dimension_semantics<parallel>], iteration_bounds = array<i64: 1>, scalar_prefetch = 0 : i64, scratch_operands = 0 : i64, tpu.core_type = #tpu.core_type<tc>, window_params = [{transform_indices = @transform_0, window_bounds = array<i64: 8, 784>}, {pipeline_mode = #tpu.pipeline_mode<synchronous>, transform_indices = @transform_1, window_bounds = array<i64: 784, 128>}, {pipeline_mode = #tpu.pipeline_mode<synchronous>, transform_indices = @transform_2, window_bounds = array<i64: 1, 128>}, {transform_indices = @transform_3, window_bounds = array<i64: 8, 128>}]} {
    %c0 = arith.constant 0 : index
    %c0_0 = arith.constant 0 : index
    %0 = vector.load %arg1[%c0, %c0_0] : memref<8x784xf32, #tpu.memory_space<vmem>>, vector<8x784xf32>
    %c0_1 = arith.constant 0 : index
    %c0_2 = arith.constant 0 : index
    %1 = vector.load %arg2[%c0_1, %c0_2] : memref<784x128xf32, #tpu.memory_space<vmem>>, vector<784x128xf32>
    %cst = arith.constant dense<0.000000e+00> : vector<8x128xf32>
    %2 = tpu.matmul %0, %1, %cst {dimension_numbers = #tpu.dot_dimension_numbers<[1], [0], [0], [1], [0, 0, 1, 1], [], []>} : vector<8x784xf32>, vector<784x128xf32>, vector<8x128xf32> -> vector<8x128xf32>
    %c0_3 = arith.constant 0 : index
    %c0_4 = arith.constant 0 : index
    %3 = vector.load %arg3[%c0_3, %c0_4] : memref<1x128xf32, #tpu.memory_space<vmem>>, vector<1x128xf32>
    %4 = vector.broadcast %3 : vector<1x128xf32> to vector<8x128xf32>
    %5 = arith.addf %2, %4 : vector<8x128xf32>
    %c0_5 = arith.constant 0 : index
    %c0_6 = arith.constant 0 : index
    %6 = vector.load %arg4[%c0_5, %c0_6] : memref<8x128xf32, #tpu.memory_space<vmem>>, vector<8x128xf32>
    tpu.vector_store %arg4[%c0_5, %c0_6], %5 {strides = array<i32>} : memref<8x128xf32, #tpu.memory_space<vmem>>, vector<8x128xf32>,
    return
  }
  func.func @transform_0(%arg0: i32) -> (i32, i32) {
    %c0_i32 = arith.constant 0 : i32
    %c0_i32_0 = arith.constant 0 : i32
    return %arg0, %c0_i32 : i32, i32
  }
  func.func @transform_1(%arg0: i32) -> (i32, i32) {
    %c0_i32 = arith.constant 0 : i32
    %c0_i32_0 = arith.constant 0 : i32
    %c0_i32_1 = arith.constant 0 : i32
    return %c0_i32, %c0_i32_0 : i32, i32
  }
  func.func @transform_2(%arg0: i32) -> (i32, i32) {
    %c0_i32 = arith.constant 0 : i32
    %c0_i32_0 = arith.constant 0 : i32
    %c0_i32_1 = arith.constant 0 : i32
    return %c0_i32, %c0_i32_0 : i32, i32
  }
  func.func @transform_3(%arg0: i32) -> (i32, i32) {
    %c0_i32 = arith.constant 0 : i32
    %c0_i32_0 = arith.constant 0 : i32
    return %arg0, %c0_i32 : i32, i32
  }
}

</mosaic_0001>

<bundles_post_ra>
// kernel: tpu_custom_call.1
= control target key start
LH: loop header
LB: loop body
LE: loop exit
PB: predicated region body
PF: predicated region fallthrough
CT: control target
= control target key end

     0   :  { %8 = vsyncpa [#allocation3], 0  ;;  %s439_s0 = inlined_call_operand.hbm [shape: f32[8,784], index: 0, kind: input, shape index: {}]   ;;  %s440_s1 = inlined_call_operand.hbm [shape: f32[784,128], index: 1, kind: input, shape index: {}]   ;;  %s441_s2 = inlined_call_operand.vmem [shape: f32[1,128], index: 2, kind: input, shape index: {}]   ;;  %s442_s3 = inlined_call_operand.hbm [shape: f32[8,128], index: 3, kind: output, shape index: {}]  }
   0x1   :  { %9 = vsyncpa [#allocation6], 0 }
   0x2   :  { %10 = vsyncpa [#allocation4], 0  ;;  %s16_s14 = sshll.u32 %s439_s0, 4  ;;  %s402_s15 = smov [#allocation2]   ;;  %s17_s14 = int_to_ptr.hbm [resolvable:$true] %s16_s14 }
   0x3   :  { %s18_s16 = sshll.u32 %s402_s15, 4  ;;  %s26_s19 = sshll.u32 %s440_s1, 4  ;;  %s19_s16 = int_to_ptr.vmem [resolvable:$true] %s18_s16  ;;  %s27_s19 = int_to_ptr.hbm [resolvable:$true] %s26_s19 }
   0x4   :  { %21 = dma.hbm_to_vmem [thread:$0]  %s17_s14, 896, %s19_s16, [#allocation3]  }
   0x5   :  { %s403_s20 = smov [#allocation5]   ;;  %s404_s22 = smov 128  }
   0x6   :  { %s28_s21 = sshll.u32 %s403_s20, 4  ;;  %s405_s23 = smov 8   ;;  %s29_s21 = int_to_ptr.vmem [resolvable:$true] %s28_s21 }
   0x7   :  { %34 = dma.hbm_to_vmem [thread:$0]  %s27_s19, 12544, %s29_s21, [#allocation6], %s404_s22, %s404_s22, %s405_s23  }
   0x8   :  { %396 = dma.done.wait [#allocation3], 896  }
   0x9   :  { %397 = vsyncadd [#allocation3], 4294966400 }
   0xa   :  { %398 = dma.done.wait [#allocation6], 12544  }
   0xb   :  { %399 = vsyncadd [#allocation6], 4294954752  ;;  %v67_v0 = vld [vmem:[#allocation5 + $0x78] sm:$0xff]  ;;  %v66_v1 = vld [vmem:[#allocation5 + $0x70] sm:$0xff]  ;;  %vm154_vm0 = vcmask 130048   ;;  %s406_s24 = smov [#allocation7]  }
   0xc   :  { %v83_v2 = vld [vmem:[#allocation5 + $0xf8] sm:$0xff]  ;;  %158 = vmatpush.msra.mxu0 %v67_v0  ;;  %v82_v3 = vld [vmem:[#allocation5 + $0xf0] sm:$0xff]  ;;  %v65_v4 = vld [vmem:[#allocation5 + $0x68] sm:$0xff]  ;;  %s304_s25 = sshll.u32 %s406_s24, 4  ;;  %s306_s28 = sshll.u32 %s442_s3, 4  ;;  %s305_s25 = int_to_ptr.vmem [resolvable:$true] %s304_s25  ;;  %s307_s28 = int_to_ptr.hbm [resolvable:$true] %s306_s28 }
   0xd   :  { %178 = vmatpush.msra.mxu1 %v83_v2  ;;  %v81_v5 = vld [vmem:[#allocation5 + $0xe8] sm:$0xff]  ;;  %v64_v6 = vld [vmem:[#allocation5 + $0x60] sm:$0xff]  ;;  %v63_v8 = vld [vmem:[#allocation5 + $0x58] sm:$0xff] }
   0xe   :  { %159 = vmatpush.msra.mxu0 %v66_v1  ;;  %v80_v7 = vld [vmem:[#allocation5 + $0xe0] sm:$0xff]  ;;  %v79_v9 = vld [vmem:[#allocation5 + $0xd8] sm:$0xff]  ;;  %v62_v10 = vld [vmem:[#allocation5 + $0x50] sm:$0xff] }
   0xf   :  { %179 = vmatpush.msra.mxu1 %v82_v3  ;;  %v99_v11 = vld [vmem:[#allocation5 + $0x178] sm:$0xff]  ;;  %v78_v12 = vld [vmem:[#allocation5 + $0xd0] sm:$0xff]  ;;  %v97_v15 = vld [vmem:[#allocation5 + $0x168] sm:$0xff] }
  0x10   :  { %160 = vmatpush.msra.mxu0 %v65_v4  ;;  %198 = vmatpush.msra.mxu2 %v99_v11  ;;  %v98_v13 = vld [vmem:[#allocation5 + $0x170] sm:$0xff]  ;;  %v115_v14 = vld [vmem:[#allocation5 + $0x1f8] sm:$0xff]  ;;  %v61_v17 = vld [vmem:[#allocation5 + $0x48] sm:$0xff] }
  0x11   :  { %180 = vmatpush.msra.mxu1 %v81_v5  ;;  %v114_v16 = vld [vmem:[#allocation5 + $0x1f0] sm:$0xff]  ;;  %v77_v18 = vld [vmem:[#allocation5 + $0xc8] sm:$0xff]  ;;  %218 = vmatpush.msra.mxu3 %v115_v14  ;;  %v96_v19 = vld [vmem:[#allocation5 + $0x160] sm:$0xff] }
  0x12   :  { %161 = vmatpush.msra.mxu0 %v64_v6  ;;  %199 = vmatpush.msra.mxu2 %v98_v13  ;;  %v113_v20 = vld [vmem:[#allocation5 + $0x1e8] sm:$0xff]  ;;  %v60_v21 = vld [vmem:[#allocation5 + $0x40] sm:$0xff]  ;;  %v95_v23 = vld [vmem:[#allocation5 + $0x158] sm:$0xff] }
  0x13   :  { %181 = vmatpush.msra.mxu1 %v80_v7  ;;  %v76_v22 = vld [vmem:[#allocation5 + $0xc0] sm:$0xff]  ;;  %219 = vmatpush.msra.mxu3 %v114_v16  ;;  %v59_v25 = vld [vmem:[#allocation5 + $0x38] sm:$0xff]  ;;  %v94_v27 = vld [vmem:[#allocation5 + $0x150] sm:$0xff] }
  0x14   :  { %162 = vmatpush.msra.mxu0 %v63_v8  ;;  %200 = vmatpush.msra.mxu2 %v97_v15  ;;  %v112_v24 = vld [vmem:[#allocation5 + $0x1e0] sm:$0xff]  ;;  %v75_v26 = vld [vmem:[#allocation5 + $0xb8] sm:$0xff]  ;;  %v58_v29 = vld [vmem:[#allocation5 + $0x30] sm:$0xff] }
  0x15   :  { %182 = vmatpush.msra.mxu1 %v79_v9  ;;  %220 = vmatpush.msra.mxu3 %v113_v20  ;;  %v111_v28 = vld [vmem:[#allocation5 + $0x1d8] sm:$0xff]  ;;  %v74_v30 = vld [vmem:[#allocation5 + $0xb0] sm:$0xff]  ;;  %v93_v31 = vld [vmem:[#allocation5 + $0x148] sm:$0xff] }
  0x16   :  { %163 = vmatpush.msra.mxu0 %v62_v10  ;;  %201 = vmatpush.msra.mxu2 %v96_v19  ;;  %v110_v32 = vld [vmem:[#allocation5 + $0x1d0] sm:$0xff]  ;;  %v57_v33 = vld [vmem:[#allocation5 + $0x28] sm:$0xff]  ;;  %v92_v35 = vld [vmem:[#allocation5 + $0x140] sm:$0xff] }
  0x17   :  { %183 = vmatpush.msra.mxu1 %v78_v12  ;;  %221 = vmatpush.msra.mxu3 %v112_v24  ;;  %v73_v34 = vld [vmem:[#allocation5 + $0xa8] sm:$0xff]  ;;  %v56_v37 = vld [vmem:[#allocation5 + $0x20] sm:$0xff]  ;;  %v91_v39 = vld [vmem:[#allocation5 + $0x138] sm:$0xff] }
  0x18   :  { %164 = vmatpush.msra.mxu0 %v61_v17  ;;  %202 = vmatpush.msra.mxu2 %v95_v23  ;;  %v109_v36 = vld [vmem:[#allocation5 + $0x1c8] sm:$0xff]  ;;  %v72_v38 = vld [vmem:[#allocation5 + $0xa0] sm:$0xff]  ;;  %v55_v41 = vld [vmem:[#allocation5 + $0x18] sm:$0xff] }
  0x19   :  { %184 = vmatpush.msra.mxu1 %v77_v18  ;;  %222 = vmatpush.msra.mxu3 %v111_v28  ;;  %v108_v40 = vld [vmem:[#allocation5 + $0x1c0] sm:$0xff]  ;;  %v71_v42 = vld [vmem:[#allocation5 + $0x98] sm:$0xff]  ;;  %v90_v43 = vld [vmem:[#allocation5 + $0x130] sm:$0xff] }
  0x1a   :  { %165 = vmatpush.msra.mxu0 %v60_v21  ;;  %203 = vmatpush.msra.mxu2 %v94_v27  ;;  %v107_v44 = vld [vmem:[#allocation5 + $0x1b8] sm:$0xff]  ;;  %v54_v45 = vld [vmem:[#allocation5 + $0x10] sm:$0xff]  ;;  %v89_v47 = vld [vmem:[#allocation5 + $0x128] sm:$0xff] }
  0x1b   :  { %185 = vmatpush.msra.mxu1 %v76_v22  ;;  %223 = vmatpush.msra.mxu3 %v110_v32  ;;  %v70_v46 = vld [vmem:[#allocation5 + $0x90] sm:$0xff]  ;;  %v53_v49 = vld [vmem:[#allocation5 + $0x8] sm:$0xff]  ;;  %v88_v51 = vld [vmem:[#allocation5 + $0x120] sm:$0xff] }
  0x1c   :  { %166 = vmatpush.msra.mxu0 %v59_v25  ;;  %204 = vmatpush.msra.mxu2 %v93_v31  ;;  %v106_v48 = vld [vmem:[#allocation5 + $0x1b0] sm:$0xff]  ;;  %v69_v50 = vld [vmem:[#allocation5 + $0x88] sm:$0xff]  ;;  %v52_v53 = vld [vmem:[#allocation5] sm:$0xff] }
  0x1d   :  { %186 = vmatpush.msra.mxu1 %v75_v26  ;;  %224 = vmatpush.msra.mxu3 %v109_v36  ;;  %v105_v52 = vld [vmem:[#allocation5 + $0x1a8] sm:$0xff]  ;;  %v68_v54 = vld [vmem:[#allocation5 + $0x80] sm:$0xff]  ;;  %v131_v55 = vld [vmem:[#allocation5 + $0x278] sm:$0xff] }
  0x1e   :  { %167 = vmatpush.msra.mxu0 %v58_v29  ;;  %205 = vmatpush.msra.mxu2 %v92_v35  ;;  %v147_v56 = vld [vmem:[#allocation5 + $0x2f8] sm:$0xff]  ;;  %v104_v58 = vld [vmem:[#allocation5 + $0x1a0] sm:$0xff]  ;;  %v130_v59 = vld [vmem:[#allocation5 + $0x270] sm:$0xff] }
  0x1f   :  { %187 = vmatpush.msra.mxu1 %v74_v30  ;;  %225 = vmatpush.msra.mxu3 %v108_v40  ;;  %v87_v57 = vld [vmem:[#allocation5 + $0x118] sm:$0xff]  ;;  %v146_v60 = vld [vmem:[#allocation5 + $0x2f0] sm:$0xff]  ;;  %v129_v63 = vld [vmem:[#allocation5 + $0x268] sm:$0xff] }
  0x20   :  { %168 = vmatpush.msra.mxu0 %v57_v33  ;;  %206 = vmatpush.msra.mxu2 %v91_v39  ;;  %v86_v61 = vld [vmem:[#allocation5 + $0x110] sm:$0xff]  ;;  %v103_v62 = vld [vmem:[#allocation5 + $0x198] sm:$0xff]  ;;  %v145_v0 = vld [vmem:[#allocation5 + $0x2e8] sm:$0xff] }
  0x21   :  { %188 = vmatpush.msra.mxu1 %v73_v34  ;;  %226 = vmatpush.msra.mxu3 %v107_v44  ;;  %v85_v1 = vld [vmem:[#allocation5 + $0x108] sm:$0xff]  ;;  %v102_v2 = vld [vmem:[#allocation5 + $0x190] sm:$0xff]  ;;  %v128_v3 = vld [vmem:[#allocation5 + $0x260] sm:$0xff] }
  0x22   :  { %169 = vmatpush.msra.mxu0 %v56_v37  ;;  %207 = vmatpush.msra.mxu2 %v90_v43  ;;  %v144_v4 = vld [vmem:[#allocation5 + $0x2e0] sm:$0xff]  ;;  %v101_v6 = vld [vmem:[#allocation5 + $0x188] sm:$0xff]  ;;  %v127_v7 = vld [vmem:[#allocation5 + $0x258] sm:$0xff] }
  0x23   :  { %189 = vmatpush.msra.mxu1 %v72_v38  ;;  %227 = vmatpush.msra.mxu3 %v106_v48  ;;  %v84_v5 = vld [vmem:[#allocation5 + $0x100] sm:$0xff]  ;;  %v143_v8 = vld [vmem:[#allocation5 + $0x2d8] sm:$0xff]  ;;  %v126_v11 = vld [vmem:[#allocation5 + $0x250] sm:$0xff] }
  0x24   :  { %170 = vmatpush.msra.mxu0 %v55_v41  ;;  %208 = vmatpush.msra.mxu2 %v89_v47  ;;  %v47_v9 = vld [vmem:[#allocation2 + $0x10] sm:$0xff]  ;;  %v100_v10 = vld [vmem:[#allocation5 + $0x180] sm:$0xff]  ;;  %v142_v12 = vld [vmem:[#allocation5 + $0x2d0] sm:$0xff] }
  0x25   :  { %190 = vmatpush.msra.mxu1 %v71_v42  ;;  %228 = vmatpush.msra.mxu3 %v105_v52  ;;  %v149_v13 = vld [vmem:[#allocation5 + $0x308] sm:$0xff]  ;;  %v48_v17 = vld [vmem:[#allocation2 + $0x18] sm:$0xff]  ;;  %v46_v18 = vld [vmem:[#allocation2 + $0x8] sm:$0xff] }
  0x26   :  { %171 = vmatpush.msra.mxu0 %v54_v45  ;;  %209 = vmatpush.msra.mxu2 %v88_v51  ;;  %v45_v14 = vld [vmem:[#allocation2] sm:$0xff]  ;;  %v124_v19 = vld [vmem:[#allocation5 + $0x240] sm:$0xff]  ;;  %v123_v22 = vld [vmem:[#allocation5 + $0x238] sm:$0xff] }
  0x27   :  { %191 = vmatpush.msra.mxu1 %v70_v46  ;;  %229 = vmatpush.msra.mxu3 %v104_v58  ;;  %v125_v15 = vld [vmem:[#allocation5 + $0x248] sm:$0xff]  ;;  %v140_v20 = vld [vmem:[#allocation5 + $0x2c0] sm:$0xff]  ;;  %v139_v23 = vld [vmem:[#allocation5 + $0x2b8] sm:$0xff] }
  0x28   :  { %172 = vmatpush.msra.mxu0 %v53_v49  ;;  %210 = vmatpush.msra.mxu2 %v87_v57  ;;  %v141_v16 = vld [vmem:[#allocation5 + $0x2c8] sm:$0xff]  ;;  %v148_v21 = vld [vmem:[#allocation5 + $0x300] sm:$0xff]  ;;  %v51_v24 = vld [vmem:[#allocation2 + $0x30] sm:$0xff] }
  0x29   :  { %192 = vmatpush.msra.mxu1 %v69_v50  ;;  %230 = vmatpush.msra.mxu3 %v103_v62  ;;  %v122_v25 = vld [vmem:[#allocation5 + $0x230] sm:$0xff]  ;;  %v121_v27 = vld [vmem:[#allocation5 + $0x228] sm:$0xff]  ;;  %v120_v29 = vld [vmem:[#allocation5 + $0x220] sm:$0xff] }
  0x2a   :  { %173 = vmatpush.msra.mxu0 %v52_v53  ;;  %211 = vmatpush.msra.mxu2 %v86_v61  ;;  %v138_v26 = vld [vmem:[#allocation5 + $0x2b0] sm:$0xff]  ;;  %v137_v28 = vld [vmem:[#allocation5 + $0x2a8] sm:$0xff]  ;;  %v136_v30 = vld [vmem:[#allocation5 + $0x2a0] sm:$0xff] }
  0x2b   :  { %193 = vmatpush.msra.mxu1 %v68_v54  ;;  %231 = vmatpush.msra.mxu3 %v102_v2  ;;  %v119_v31 = vld [vmem:[#allocation5 + $0x218] sm:$0xff]  ;;  %v118_v33 = vld [vmem:[#allocation5 + $0x210] sm:$0xff]  ;;  %v117_v35 = vld [vmem:[#allocation5 + $0x208] sm:$0xff] }
  0x2c   :  { %238 = vmatpush.msrb.mxu0 %v131_v55  ;;  %212 = vmatpush.msra.mxu2 %v85_v1  ;;  %v135_v32 = vld [vmem:[#allocation5 + $0x298] sm:$0xff]  ;;  %v134_v34 = vld [vmem:[#allocation5 + $0x290] sm:$0xff]  ;;  %v133_v36 = vld [vmem:[#allocation5 + $0x288] sm:$0xff] }
  0x2d   :  { %258 = vmatpush.msrb.mxu1 %v147_v56  ;;  %232 = vmatpush.msra.mxu3 %v101_v6  ;;  %v116_v37 = vld [vmem:[#allocation5 + $0x200] sm:$0xff]  ;;  %v49_v39 = vld [vmem:[#allocation2 + $0x20] sm:$0xff]  ;;  %v50_v40 = vld [vmem:[#allocation2 + $0x28] sm:$0xff] }
  0x2e   :  { %239 = vmatpush.msrb.mxu0 %v130_v59  ;;  %213 = vmatpush.msra.mxu2 %v84_v5  ;;  %v132_v38 = vld [vmem:[#allocation5 + $0x280] sm:$0xff]  ;;  %v323_v41 = vld [vmem:[%s441_s2] ss:$0 sm:$0xff] }
  0x2f   :  { %259 = vmatpush.msrb.mxu1 %v146_v60  ;;  %214 = vmatmul.f32.vlgmr.msra.gmra.mxu2 %v47_v9 }
  0x30   :  { %240 = vmatpush.msrb.mxu0 %v129_v63  ;;  %233 = vmatpush.msra.mxu3 %v100_v10 }
  0x31   :  { %260 = vmatpush.msrb.mxu1 %v145_v0  ;;  %292 = vmatpush.msrb.mxu2 %v149_v13 }
  0x32   :  { %241 = vmatpush.msrb.mxu0 %v128_v3  ;;  %234 = vmatmul.f32.vlgmr.msra.gmra.mxu3 %v48_v17 }
  0x33   :  { %261 = vmatpush.msrb.mxu1 %v144_v4  ;;  %174 = vmatmul.f32.vlgmr.msra.gmra.mxu0 %v45_v14 }
  0x34   :  { %242 = vmatpush.msrb.mxu0 %v127_v7  ;;  %194 = vmatmul.f32.vlgmr.msra.gmra.mxu1 %v46_v18 }
  0x35   :  { %262 = vmatpush.msrb.mxu1 %v143_v8  ;;  %293 = vmatpush.msrb.mxu2 %v148_v21 }
  0x36   :  { %243 = vmatpush.msrb.mxu0 %v126_v11 }
  0x37   :  { %263 = vmatpush.msrb.mxu1 %v142_v12  ;;  %317 = vmatmul.msk.f32.vlgmr.msrb.gmra.mxu2 %vm154_vm0, %v51_v24 }
  0x38   :  { %244 = vmatpush.msrb.mxu0 %v125_v15 }
  0x39   :  { %264 = vmatpush.msrb.mxu1 %v141_v16 }
  0x3a   :  { %245 = vmatpush.msrb.mxu0 %v124_v19 }
  0x3b   :  { %265 = vmatpush.msrb.mxu1 %v140_v20 }
  0x3c   :  { %246 = vmatpush.msrb.mxu0 %v123_v22 }
  0x3d   :  { %266 = vmatpush.msrb.mxu1 %v139_v23 }
  0x3e   :  { %247 = vmatpush.msrb.mxu0 %v122_v25 }
  0x3f   :  { %267 = vmatpush.msrb.mxu1 %v138_v26 }
  0x40   :  { %248 = vmatpush.msrb.mxu0 %v121_v27 }
  0x41   :  { %268 = vmatpush.msrb.mxu1 %v137_v28 }
  0x42   :  { %249 = vmatpush.msrb.mxu0 %v120_v29 }
  0x43   :  { %269 = vmatpush.msrb.mxu1 %v136_v30 }
  0x44   :  { %250 = vmatpush.msrb.mxu0 %v119_v31 }
  0x45   :  { %270 = vmatpush.msrb.mxu1 %v135_v32 }
  0x46   :  { %251 = vmatpush.msrb.mxu0 %v118_v33 }
  0x47   :  { %271 = vmatpush.msrb.mxu1 %v134_v34 }
  0x48   :  { %252 = vmatpush.msrb.mxu0 %v117_v35 }
  0x49   :  { %272 = vmatpush.msrb.mxu1 %v133_v36 }
  0x4a   :  { %253 = vmatpush.msrb.mxu0 %v116_v37 }
  0x4b   :  { %273 = vmatpush.msrb.mxu1 %v132_v38  ;;  %254 = vmatmul.f32.vlgmr.msrb.gmra.mxu0 %v49_v39 }
  0x4c   :  { %274 = vmatmul.f32.vlgmr.msrb.gmra.mxu1 %v50_v40 }
  0xb0   :  { %v175_v42 = vpop.f32.mrf.mxu0 }
  0xb1   :  { %v176_v43 = vadd.f32 %v323_v41, %v175_v42  ;;  %v195_v44 = vpop.f32.mrf.mxu1 }
  0xb2   :  { %v215_v46 = vpop.f32.mrf.mxu2 }
  0xb3   :  { %v196_v45 = vadd.f32 %v195_v44, %v176_v43 }
  0xb5   :  { %v216_v47 = vadd.f32 %v215_v46, %v196_v45  ;;  %v235_v48 = vpop.f32.mrf.mxu3 }
  0xb7   :  { %v236_v49 = vadd.f32 %v235_v48, %v216_v47 }
  0xba   :  { %v295_v53 = vpop.f32.mrf.mxu2 }
  0xc8   :  { %v255_v50 = vpop.f32.mrf.mxu0 }
  0xc9   :  { %v275_v51 = vpop.f32.mrf.mxu1  ;;  %v256_v52 = vadd.f32 %v255_v50, %v236_v49 }
  0xcb   :  { %v276_v54 = vadd.f32 %v275_v51, %v256_v52 }
  0xcd   :  { %v296_v55 = vadd.f32 %v295_v53, %v276_v54 }
  0xcf   :  { %298 = vst [vmem:[#allocation7] sm:$0xff] %v296_v55 }
  0xd0   :  { %309 = dma.vmem_to_hbm [thread:$0]  %s305_s25, 128, %s307_s28, [#allocation4]  }
  0xd1   :  { %400 = dma.done.wait [#allocation4], 128  }
  0xd2   :  { %401 = vsyncadd [#allocation4], 4294967168 }
  0xd3   :  { %314 = vsyncpa [#allocation3], 1 }
  0xd4   :  { %315 = vsyncpa [#allocation6], 1 }
  0xd5   :  { %316 = vsyncpa [#allocation4], 1 }

</bundles_post_ra>
